<compile_context>
chip_gen: v7x
topology: tpu7x:2x2x1
jax: 0.10.0
libtpu: 0.0.40
codegen_flags: <defaults>
</compile_context>

<pallas_src>
import functools

import jax
import jax.numpy as jnp
from jax import lax
from jax.experimental import pallas as pl
from jax.experimental.pallas import tpu as pltpu


# ---------------------------------------------------------------------------
# Fused kernel: LayerNorm + flash multi-head self-attention + out projection
# Grid = (batch b, query tile qi, head h, key tile ki); ki innermost.
# ---------------------------------------------------------------------------
def _prenorm_flash_attn_kernel(
        xq_ref, xk_ref, g_ref, b_ref, wq_ref, wk_ref, wv_ref, wo_ref,   # inputs
        o_ref,                                                           # output
        q_scr, m_scr, l_scr, acc_scr, y_scr,                             # scratch
        *, eps, mxu_dtype, approx_reciprocal):
    h = pl.program_id(2)
    ki = pl.program_id(3)
    nh = pl.num_programs(2)
    nk = pl.num_programs(3)

    d = q_scr.shape[-1]
    scale = float(d) ** -0.5

    gamma = g_ref[...].astype(jnp.float32)      # (1, dim) -- hoisted once per step
    beta = b_ref[...].astype(jnp.float32)

    def layernorm(x2d):                         # f32 in / f32 out
        mu = jnp.mean(x2d, axis=-1, keepdims=True)
        c = x2d - mu
        var = jnp.mean(c * c, axis=-1, keepdims=True)
        return (c * lax.rsqrt(var + eps)) * gamma + beta

    # ---- new (b, qi) tile: zero the cross-head output accumulator ----------
    @pl.when(jnp.logical_and(h == 0, ki == 0))
    def _():
        y_scr[...] = jnp.zeros_like(y_scr)

    # ---- new (b, qi, h): project q once, reset online-softmax state --------
    @pl.when(ki == 0)
    def _():
        xq = xq_ref[0].astype(jnp.float32)                            # (tq, dim)
        q = jnp.dot(layernorm(xq).astype(mxu_dtype),
                    wq_ref[0].astype(mxu_dtype),
                    preferred_element_type=jnp.float32)               # (tq, d)
        q_scr[...] = (q * scale).astype(q_scr.dtype)
        m_scr[...] = jnp.full_like(m_scr, -jnp.inf)
        l_scr[...] = jnp.zeros_like(l_scr)
        acc_scr[...] = jnp.zeros_like(acc_scr)

    # ---- k/v for this key tile + head ---------------------------------------
    # TODO(synk): for very large N, hoist k/v projection into a separate pass
    # to avoid recomputing LayerNorm+projection per (qi, h).
    xk = xk_ref[0].astype(jnp.float32)                                # (tk, dim)
    xn_k = layernorm(xk).astype(mxu_dtype)
    k = jnp.dot(xn_k, wk_ref[0].astype(mxu_dtype),
                preferred_element_type=jnp.float32).astype(mxu_dtype)  # (tk, d)
    v = jnp.dot(xn_k, wv_ref[0].astype(mxu_dtype),
                preferred_element_type=jnp.float32).astype(mxu_dtype)  # (tk, d)

    # ---- online softmax: only a (tq, tk) score tile ever exists -------------
    s = lax.dot_general(q_scr[...], k, (((1,), (1,)), ((), ())),      # q @ k^T
                        preferred_element_type=jnp.float32)           # (tq, tk)
    m_prev = m_scr[...]
    m_new = jnp.maximum(m_prev, jnp.max(s, axis=-1, keepdims=True))
    alpha = jnp.exp(m_prev - m_new)
    p = jnp.exp(s - m_new)
    l_scr[...] = alpha * l_scr[...] + jnp.sum(p, axis=-1, keepdims=True)
    acc_scr[...] = alpha * acc_scr[...] + jnp.dot(
        p.astype(mxu_dtype), v, preferred_element_type=jnp.float32)   # (tq, d)
    m_scr[...] = m_new

    # ---- last key tile of this head: fold into the output projection -------
    last_k = ki == nk - 1

    @pl.when(last_k)
    def _():
        if approx_reciprocal:
            inv_l = pl.reciprocal(l_scr[...], approx=True)            # EUP, ~free
        else:
            inv_l = 1.0 / l_scr[...]
        o_h = acc_scr[...] * inv_l                                    # (tq, d)
        y_scr[...] += jnp.dot(o_h.astype(mxu_dtype),
                              wo_ref[0].astype(mxu_dtype),
                              preferred_element_type=jnp.float32)     # (tq, dim)

    @pl.when(jnp.logical_and(last_k, h == nh - 1))
    def _():
        o_ref[...] = y_scr[...].reshape(o_ref.shape).astype(o_ref.dtype)


# ---------------------------------------------------------------------------
# Wrapper: tiled pallas_call with resident per-head weights
# ---------------------------------------------------------------------------
def prenorm_attention_forward(x, gamma, beta, w_qkv, w_out, heads, dim_head,
                              eps=1e-5, mxu_dtype=jnp.bfloat16,
                              tq=None, tk=None, approx_reciprocal=True):
    """
    x:     (B, N, dim)
    gamma: (dim,)   LayerNorm weight
    beta:  (dim,)   LayerNorm bias
    w_qkv: (3*inner, dim)  -- PyTorch Linear weight layout (out, in), no bias
    w_out: (dim, inner)    -- PyTorch Linear weight layout (out, in)
    mxu_dtype: bf16 default (MXU-native on v5e/v6e/v7x); f32 accumulation.
    """
    B, N, dim = x.shape
    inner = heads * dim_head
    assert w_qkv.shape == (3 * inner, dim)
    assert w_out.shape == (dim, inner)

    tq = min(N, 128) if tq is None else tq
    tk = min(N, 128) if tk is None else tk
    # TODO(synk): pad/mask ragged sequence lengths instead of requiring divisibility.
    assert N % tq == 0 and N % tk == 0

    # One-time wrapper-side re-layout: PyTorch (out,in) -> MXU-canonical (in,out),
    # split per head so the kernel never lane-slices activations or weights.
    wq_h = w_qkv[0 * inner:1 * inner].reshape(heads, dim_head, dim).transpose(0, 2, 1)
    wk_h = w_qkv[1 * inner:2 * inner].reshape(heads, dim_head, dim).transpose(0, 2, 1)
    wv_h = w_qkv[2 * inner:3 * inner].reshape(heads, dim_head, dim).transpose(0, 2, 1)
    wo_h = w_out.reshape(dim, heads, dim_head).transpose(1, 2, 0)      # (heads, d, dim)

    g2 = gamma.reshape(1, dim)
    b2 = beta.reshape(1, dim)

    grid = (B, N // tq, heads, N // tk)

    # Advisory cost estimate for XLA's scheduler around the custom call.
    flops = int(2 * B * N * dim * 3 * inner            # q/k/v projections
                + 4 * B * heads * N * N * dim_head      # scores + p @ v
                + 2 * B * N * inner * dim)              # output projection
    transcendentals = int(B * heads * N * N + B * N)    # exp + rsqrt
    bytes_accessed = int(x.size * x.dtype.itemsize * 2
                         + (w_qkv.size + w_out.size + gamma.size + beta.size) * 4
                         + B * N * dim * x.dtype.itemsize)

    # VMEM budget: double-buffered tiles + per-head weight blocks + scratch.
    f32 = 4
    need = (2 * (tq + tk) * dim                              # x tiles (x2 buffers)
            + 2 * 2 * dim                                    # gamma / beta
            + 2 * (3 * dim * dim_head + dim_head * dim)      # per-head weights (x2)
            + 2 * tq * dim                                   # output tile
            + tq * (2 * dim_head + 2 + dim)) * f32 * 2       # scratch + headroom
    vmem_limit = int(min(max(need, 32 << 20), 48 << 20))     # <= half of v7x physical

    kern = functools.partial(_prenorm_flash_attn_kernel, eps=eps,
                             mxu_dtype=mxu_dtype,
                             approx_reciprocal=approx_reciprocal)

    return pl.pallas_call(
        kern,
        out_shape=jax.ShapeDtypeStruct((B, N, dim), x.dtype),
        grid_spec=pltpu.PrefetchScalarGridSpec(
            num_scalar_prefetch=0,
            grid=grid,
            in_specs=[
                pl.BlockSpec((1, tq, dim), lambda b, qi, h, ki: (b, qi, 0)),       # x (queries)
                pl.BlockSpec((1, tk, dim), lambda b, qi, h, ki: (b, ki, 0)),       # x (keys/vals)
                pl.BlockSpec((1, dim), lambda b, qi, h, ki: (0, 0)),               # gamma
                pl.BlockSpec((1, dim), lambda b, qi, h, ki: (0, 0)),               # beta
                pl.BlockSpec((1, dim, dim_head), lambda b, qi, h, ki: (h, 0, 0)),  # Wq[h]
                pl.BlockSpec((1, dim, dim_head), lambda b, qi, h, ki: (h, 0, 0)),  # Wk[h]
                pl.BlockSpec((1, dim, dim_head), lambda b, qi, h, ki: (h, 0, 0)),  # Wv[h]
                pl.BlockSpec((1, dim_head, dim), lambda b, qi, h, ki: (h, 0, 0)),  # Wout[h]
            ],
            out_specs=pl.BlockSpec((1, tq, dim), lambda b, qi, h, ki: (b, qi, 0)),
            scratch_shapes=[
                pltpu.VMEM((tq, dim_head), mxu_dtype),    # q (pre-scaled)
                pltpu.VMEM((tq, 1), jnp.float32),         # m (running max)
                pltpu.VMEM((tq, 1), jnp.float32),         # l (running denom)
                pltpu.VMEM((tq, dim_head), jnp.float32),  # per-head accumulator
                pltpu.VMEM((tq, dim), jnp.float32),       # cross-head output slab
            ]),
        compiler_params=pltpu.CompilerParams(
            dimension_semantics=("parallel", "parallel", "arbitrary", "arbitrary"),
            vmem_limit_bytes=vmem_limit),
        cost_estimate=pl.CostEstimate(flops=flops,
                                      transcendentals=transcendentals,
                                      bytes_accessed=bytes_accessed),
    )(x, x, g2, b2, wq_h, wk_h, wv_h, wo_h)


# ---------------------------------------------------------------------------
# Pure-JAX reference for verification
# ---------------------------------------------------------------------------
def prenorm_attention_reference(x, gamma, beta, w_qkv, w_out, heads, eps=1e-5):
    B, N, dim = x.shape
    inner = w_qkv.shape[0] // 3
    d = inner // heads
    scale = float(d) ** -0.5
    mean = jnp.mean(x, axis=-1, keepdims=True)
    var = jnp.mean((x - mean) ** 2, axis=-1, keepdims=True)
    xn = (x - mean) / jnp.sqrt(var + eps) * gamma + beta
    qkv = xn @ w_qkv.T
    q, k, v = jnp.split(qkv, 3, axis=-1)
    rs = lambda t: t.reshape(B, N, heads, d).transpose(0, 2, 1, 3)
    q, k, v = map(rs, (q, k, v))
    dots = jnp.einsum("bhnd,bhmd->bhnm", q, k) * scale
    attn = jax.nn.softmax(dots, axis=-1)
    out = jnp.einsum("bhnm,bhmd->bhnd", attn, v)
    out = out.transpose(0, 2, 1, 3).reshape(B, N, inner)
    return out @ w_out.T


# ---------------------------------------------------------------------------
# Main
# ---------------------------------------------------------------------------
if __name__ == "__main__":
    # Small shapes consistent with PreNorm(dim=32, Attention(dim=32, heads=2, dim_head=16)).
    # NOTE: demo dims are far below TPU tile granularity (lane width 128); real models
    # should use dim / dim_head that are multiples of 128 for lane-dense stores.
    B, N, dim = 2, 8, 32
    heads, dim_head = 2, 16
    inner = heads * dim_head

    key = jax.random.PRNGKey(0)
    kx, kg, kb, kqkv, kout = jax.random.split(key, 5)

    x = jax.random.normal(kx, (B, N, dim), dtype=jnp.float32)
    gamma = 1.0 + 0.1 * jax.random.normal(kg, (dim,), dtype=jnp.float32)
    beta = 0.1 * jax.random.normal(kb, (dim,), dtype=jnp.float32)
    # Deterministic synthetic parameters (PyTorch Linear weight layout: (out, in))
    w_qkv = jax.random.normal(kqkv, (3 * inner, dim), dtype=jnp.float32) * 0.05
    w_out = jax.random.normal(kout, (dim, inner), dtype=jnp.float32) * 0.05

    y = prenorm_attention_forward(x, gamma, beta, w_qkv, w_out, heads, dim_head)
    y = jax.block_until_ready(y)

    y_ref = prenorm_attention_reference(x, gamma, beta, w_qkv, w_out, heads)
    assert y.shape == (B, N, dim)
    assert jnp.allclose(y, y_ref, atol=2e-2, rtol=2e-2), (
        "Pallas output mismatch vs reference: max abs diff = "
        f"{float(jnp.max(jnp.abs(y - y_ref)))}")

    print("KERNEL_OK")
</pallas_src>

<mosaic_0001>
module attributes {stable_mosaic.version = 11 : i64} {
  func.func @_prenorm_flash_attn_kernel(%arg0: i32, %arg1: i32, %arg2: i32, %arg3: i32, %arg4: memref<1x8x32xf32, #tpu.memory_space<vmem>>, %arg5: memref<1x8x32xf32, #tpu.memory_space<vmem>>, %arg6: memref<1x32xf32, #tpu.memory_space<vmem>>, %arg7: memref<1x32xf32, #tpu.memory_space<vmem>>, %arg8: memref<1x32x16xf32, #tpu.memory_space<vmem>>, %arg9: memref<1x32x16xf32, #tpu.memory_space<vmem>>, %arg10: memref<1x32x16xf32, #tpu.memory_space<vmem>>, %arg11: memref<1x16x32xf32, #tpu.memory_space<vmem>>, %arg12: memref<1x8x32xf32, #tpu.memory_space<vmem>>, %arg13: memref<8x16xbf16, #tpu.memory_space<vmem>>, %arg14: memref<8x1xf32, #tpu.memory_space<vmem>>, %arg15: memref<8x1xf32, #tpu.memory_space<vmem>>, %arg16: memref<8x16xf32, #tpu.memory_space<vmem>>, %arg17: memref<8x32xf32, #tpu.memory_space<vmem>>) attributes {dimension_semantics = [#tpu.dimension_semantics<parallel>, #tpu.dimension_semantics<parallel>, #tpu.dimension_semantics<arbitrary>, #tpu.dimension_semantics<arbitrary>], iteration_bounds = array<i64: 2, 1, 2, 1>, scalar_prefetch = 0 : i64, scratch_operands = 5 : i64, tpu.core_type = #tpu.core_type<tc>, window_params = [{transform_indices = @transform_0, window_bounds = array<i64: 1, 8, 32>}, {transform_indices = @transform_1, window_bounds = array<i64: 1, 8, 32>}, {pipeline_mode = #tpu.pipeline_mode<synchronous>, transform_indices = @transform_2, window_bounds = array<i64: 1, 32>}, {pipeline_mode = #tpu.pipeline_mode<synchronous>, transform_indices = @transform_3, window_bounds = array<i64: 1, 32>}, {transform_indices = @transform_4, window_bounds = array<i64: 1, 32, 16>}, {transform_indices = @transform_5, window_bounds = array<i64: 1, 32, 16>}, {transform_indices = @transform_6, window_bounds = array<i64: 1, 32, 16>}, {transform_indices = @transform_7, window_bounds = array<i64: 1, 16, 32>}, {transform_indices = @transform_8, window_bounds = array<i64: 1, 8, 32>}]} {
    %c0 = arith.constant 0 : index
    %c0_0 = arith.constant 0 : index
    %0 = vector.load %arg6[%c0, %c0_0] : memref<1x32xf32, #tpu.memory_space<vmem>>, vector<1x32xf32>
    %c0_1 = arith.constant 0 : index
    %c0_2 = arith.constant 0 : index
    %1 = vector.load %arg7[%c0_1, %c0_2] : memref<1x32xf32, #tpu.memory_space<vmem>>, vector<1x32xf32>
    %c0_i32 = arith.constant 0 : i32
    %2 = arith.cmpi eq, %arg2, %c0_i32 : i32
    %c0_i32_3 = arith.constant 0 : i32
    %3 = arith.cmpi eq, %arg3, %c0_i32_3 : i32
    %4 = arith.andi %2, %3 : i1
    %5 = arith.extui %4 : i1 to i32
    %c0_i32_4 = arith.constant 0 : i32
    %6 = arith.cmpi ne, %5, %c0_i32_4 : i32
    scf.if %6 {
      %cst_43 = arith.constant 0.000000e+00 : f32
      %75 = vector.broadcast %cst_43 : f32 to vector<8x32xf32>
      %c0_44 = arith.constant 0 : index
      %c0_45 = arith.constant 0 : index
      %76 = vector.load %arg17[%c0_44, %c0_45] : memref<8x32xf32, #tpu.memory_space<vmem>>, vector<8x32xf32>
      tpu.vector_store %arg17[%c0_44, %c0_45], %75 {strides = array<i32>} : memref<8x32xf32, #tpu.memory_space<vmem>>, vector<8x32xf32>,
    } else {
    }
    %c0_i32_5 = arith.constant 0 : i32
    %7 = arith.cmpi eq, %arg3, %c0_i32_5 : i32
    %8 = arith.extui %7 : i1 to i32
    %c0_i32_6 = arith.constant 0 : i32
    %9 = arith.cmpi ne, %8, %c0_i32_6 : i32
    scf.if %9 {
      %c0_43 = arith.constant 0 : index
      %c0_44 = arith.constant 0 : index
      %c0_45 = arith.constant 0 : index
      %75 = vector.load %arg4[%c0_43, %c0_44, %c0_45] : memref<1x8x32xf32, #tpu.memory_space<vmem>>, vector<1x8x32xf32>
      %76 = vector.shape_cast %75 : vector<1x8x32xf32> to vector<8x32xf32>
      %cst_46 = arith.constant dense<0.000000e+00> : vector<8xf32>
      %77 = vector.multi_reduction <add>, %76, %cst_46 [1] : vector<8x32xf32> to vector<8xf32>
      %78 = vector.shape_cast %77 : vector<8xf32> to vector<8x1xf32>
      %cst_47 = arith.constant 3.200000e+01 : f32
      %79 = vector.broadcast %cst_47 : f32 to vector<8x1xf32>
      %80 = arith.divf %78, %79 : vector<8x1xf32>
      %81 = vector.broadcast %80 : vector<8x1xf32> to vector<8x32xf32>
      %82 = arith.subf %76, %81 : vector<8x32xf32>
      %83 = arith.mulf %82, %82 : vector<8x32xf32>
      %cst_48 = arith.constant dense<0.000000e+00> : vector<8xf32>
      %84 = vector.multi_reduction <add>, %83, %cst_48 [1] : vector<8x32xf32> to vector<8xf32>
      %85 = vector.shape_cast %84 : vector<8xf32> to vector<8x1xf32>
      %cst_49 = arith.constant 3.200000e+01 : f32
      %86 = vector.broadcast %cst_49 : f32 to vector<8x1xf32>
      %87 = arith.divf %85, %86 : vector<8x1xf32>
      %cst_50 = arith.constant 9.99999974E-6 : f32
      %88 = vector.broadcast %cst_50 : f32 to vector<8x1xf32>
      %89 = arith.addf %87, %88 : vector<8x1xf32>
      %90 = math.rsqrt %89 : vector<8x1xf32>
      %91 = vector.broadcast %90 : vector<8x1xf32> to vector<8x32xf32>
      %92 = arith.mulf %82, %91 : vector<8x32xf32>
      %93 = vector.broadcast %0 : vector<1x32xf32> to vector<8x32xf32>
      %94 = arith.mulf %92, %93 : vector<8x32xf32>
      %95 = vector.broadcast %1 : vector<1x32xf32> to vector<8x32xf32>
      %96 = arith.addf %94, %95 : vector<8x32xf32>
      %97 = arith.truncf %96 : vector<8x32xf32> to vector<8x32xbf16>
      %c0_51 = arith.constant 0 : index
      %c0_52 = arith.constant 0 : index
      %c0_53 = arith.constant 0 : index
      %98 = vector.load %arg8[%c0_51, %c0_52, %c0_53] : memref<1x32x16xf32, #tpu.memory_space<vmem>>, vector<1x32x16xf32>
      %99 = vector.shape_cast %98 : vector<1x32x16xf32> to vector<32x16xf32>
      %100 = arith.truncf %99 : vector<32x16xf32> to vector<32x16xbf16>
      %cst_54 = arith.constant dense<0.000000e+00> : vector<8x16xf32>
      %101 = tpu.matmul %97, %100, %cst_54 {dimension_numbers = #tpu.dot_dimension_numbers<[1], [0], [0], [1], [0, 0, 1, 1], [], []>} : vector<8x32xbf16>, vector<32x16xbf16>, vector<8x16xf32> -> vector<8x16xf32>
      %cst_55 = arith.constant 2.500000e-01 : f32
      %102 = vector.broadcast %cst_55 : f32 to vector<8x16xf32>
      %103 = arith.mulf %101, %102 : vector<8x16xf32>
      %104 = arith.truncf %103 : vector<8x16xf32> to vector<8x16xbf16>
      %c0_56 = arith.constant 0 : index
      %c0_57 = arith.constant 0 : index
      %105 = vector.load %arg13[%c0_56, %c0_57] : memref<8x16xbf16, #tpu.memory_space<vmem>>, vector<8x16xbf16>
      tpu.vector_store %arg13[%c0_56, %c0_57], %104 {strides = array<i32>} : memref<8x16xbf16, #tpu.memory_space<vmem>>, vector<8x16xbf16>,
      %cst_58 = arith.constant 0xFF800000 : f32
      %106 = vector.broadcast %cst_58 : f32 to vector<8x1xf32>
      %c0_59 = arith.constant 0 : index
      %c0_60 = arith.constant 0 : index
      %107 = vector.load %arg14[%c0_59, %c0_60] : memref<8x1xf32, #tpu.memory_space<vmem>>, vector<8x1xf32>
      tpu.vector_store %arg14[%c0_59, %c0_60], %106 {strides = array<i32>} : memref<8x1xf32, #tpu.memory_space<vmem>>, vector<8x1xf32>,
      %cst_61 = arith.constant 0.000000e+00 : f32
      %108 = vector.broadcast %cst_61 : f32 to vector<8x1xf32>
      %c0_62 = arith.constant 0 : index
      %c0_63 = arith.constant 0 : index
      %109 = vector.load %arg15[%c0_62, %c0_63] : memref<8x1xf32, #tpu.memory_space<vmem>>, vector<8x1xf32>
      tpu.vector_store %arg15[%c0_62, %c0_63], %108 {strides = array<i32>} : memref<8x1xf32, #tpu.memory_space<vmem>>, vector<8x1xf32>,
      %cst_64 = arith.constant 0.000000e+00 : f32
      %110 = vector.broadcast %cst_64 : f32 to vector<8x16xf32>
      %c0_65 = arith.constant 0 : index
      %c0_66 = arith.constant 0 : index
      %111 = vector.load %arg16[%c0_65, %c0_66] : memref<8x16xf32, #tpu.memory_space<vmem>>, vector<8x16xf32>
      tpu.vector_store %arg16[%c0_65, %c0_66], %110 {strides = array<i32>} : memref<8x16xf32, #tpu.memory_space<vmem>>, vector<8x16xf32>,
    } else {
    }
    %c0_7 = arith.constant 0 : index
    %c0_8 = arith.constant 0 : index
    %c0_9 = arith.constant 0 : index
    %10 = vector.load %arg5[%c0_7, %c0_8, %c0_9] : memref<1x8x32xf32, #tpu.memory_space<vmem>>, vector<1x8x32xf32>
    %11 = vector.shape_cast %10 : vector<1x8x32xf32> to vector<8x32xf32>
    %cst = arith.constant dense<0.000000e+00> : vector<8xf32>
    %12 = vector.multi_reduction <add>, %11, %cst [1] : vector<8x32xf32> to vector<8xf32>
    %13 = vector.shape_cast %12 : vector<8xf32> to vector<8x1xf32>
    %cst_10 = arith.constant 3.200000e+01 : f32
    %14 = vector.broadcast %cst_10 : f32 to vector<8x1xf32>
    %15 = arith.divf %13, %14 : vector<8x1xf32>
    %16 = vector.broadcast %15 : vector<8x1xf32> to vector<8x32xf32>
    %17 = arith.subf %11, %16 : vector<8x32xf32>
    %18 = arith.mulf %17, %17 : vector<8x32xf32>
    %cst_11 = arith.constant dense<0.000000e+00> : vector<8xf32>
    %19 = vector.multi_reduction <add>, %18, %cst_11 [1] : vector<8x32xf32> to vector<8xf32>
    %20 = vector.shape_cast %19 : vector<8xf32> to vector<8x1xf32>
    %cst_12 = arith.constant 3.200000e+01 : f32
    %21 = vector.broadcast %cst_12 : f32 to vector<8x1xf32>
    %22 = arith.divf %20, %21 : vector<8x1xf32>
    %cst_13 = arith.constant 9.99999974E-6 : f32
    %23 = vector.broadcast %cst_13 : f32 to vector<8x1xf32>
    %24 = arith.addf %22, %23 : vector<8x1xf32>
    %25 = math.rsqrt %24 : vector<8x1xf32>
    %26 = vector.broadcast %25 : vector<8x1xf32> to vector<8x32xf32>
    %27 = arith.mulf %17, %26 : vector<8x32xf32>
    %28 = vector.broadcast %0 : vector<1x32xf32> to vector<8x32xf32>
    %29 = arith.mulf %27, %28 : vector<8x32xf32>
    %30 = vector.broadcast %1 : vector<1x32xf32> to vector<8x32xf32>
    %31 = arith.addf %29, %30 : vector<8x32xf32>
    %32 = arith.truncf %31 : vector<8x32xf32> to vector<8x32xbf16>
    %c0_14 = arith.constant 0 : index
    %c0_15 = arith.constant 0 : index
    %c0_16 = arith.constant 0 : index
    %33 = vector.load %arg9[%c0_14, %c0_15, %c0_16] : memref<1x32x16xf32, #tpu.memory_space<vmem>>, vector<1x32x16xf32>
    %34 = vector.shape_cast %33 : vector<1x32x16xf32> to vector<32x16xf32>
    %35 = arith.truncf %34 : vector<32x16xf32> to vector<32x16xbf16>
    %cst_17 = arith.constant dense<0.000000e+00> : vector<8x16xf32>
    %36 = tpu.matmul %32, %35, %cst_17 {dimension_numbers = #tpu.dot_dimension_numbers<[1], [0], [0], [1], [0, 0, 1, 1], [], []>} : vector<8x32xbf16>, vector<32x16xbf16>, vector<8x16xf32> -> vector<8x16xf32>
    %37 = arith.truncf %36 : vector<8x16xf32> to vector<8x16xbf16>
    %c0_18 = arith.constant 0 : index
    %c0_19 = arith.constant 0 : index
    %c0_20 = arith.constant 0 : index
    %38 = vector.load %arg10[%c0_18, %c0_19, %c0_20] : memref<1x32x16xf32, #tpu.memory_space<vmem>>, vector<1x32x16xf32>
    %39 = vector.shape_cast %38 : vector<1x32x16xf32> to vector<32x16xf32>
    %40 = arith.truncf %39 : vector<32x16xf32> to vector<32x16xbf16>
    %cst_21 = arith.constant dense<0.000000e+00> : vector<8x16xf32>
    %41 = tpu.matmul %32, %40, %cst_21 {dimension_numbers = #tpu.dot_dimension_numbers<[1], [0], [0], [1], [0, 0, 1, 1], [], []>} : vector<8x32xbf16>, vector<32x16xbf16>, vector<8x16xf32> -> vector<8x16xf32>
    %42 = arith.truncf %41 : vector<8x16xf32> to vector<8x16xbf16>
    %c0_22 = arith.constant 0 : index
    %c0_23 = arith.constant 0 : index
    %43 = vector.load %arg13[%c0_22, %c0_23] : memref<8x16xbf16, #tpu.memory_space<vmem>>, vector<8x16xbf16>
    %cst_24 = arith.constant dense<0.000000e+00> : vector<8x8xf32>
    %44 = tpu.matmul %43, %37, %cst_24 {dimension_numbers = #tpu.dot_dimension_numbers<[1], [1], [0], [0], [0, 0, 1, 0], [], []>} : vector<8x16xbf16>, vector<8x16xbf16>, vector<8x8xf32> -> vector<8x8xf32>
    %c0_25 = arith.constant 0 : index
    %c0_26 = arith.constant 0 : index
    %45 = vector.load %arg14[%c0_25, %c0_26] : memref<8x1xf32, #tpu.memory_space<vmem>>, vector<8x1xf32>
    %cst_27 = arith.constant dense<0xFF800000> : vector<8xf32>
    %46 = vector.multi_reduction <maximumf>, %44, %cst_27 [1] : vector<8x8xf32> to vector<8xf32>
    %47 = vector.shape_cast %46 : vector<8xf32> to vector<8x1xf32>
    %48 = arith.maximumf %45, %47 : vector<8x1xf32>
    %49 = arith.subf %45, %48 : vector<8x1xf32>
    %50 = math.exp %49 : vector<8x1xf32>
    %51 = vector.broadcast %48 : vector<8x1xf32> to vector<8x8xf32>
    %52 = arith.subf %44, %51 : vector<8x8xf32>
    %53 = math.exp %52 : vector<8x8xf32>
    %c0_28 = arith.constant 0 : index
    %c0_29 = arith.constant 0 : index
    %54 = vector.load %arg15[%c0_28, %c0_29] : memref<8x1xf32, #tpu.memory_space<vmem>>, vector<8x1xf32>
    %55 = arith.mulf %50, %54 : vector<8x1xf32>
    %cst_30 = arith.constant dense<0.000000e+00> : vector<8xf32>
    %56 = vector.multi_reduction <add>, %53, %cst_30 [1] : vector<8x8xf32> to vector<8xf32>
    %57 = vector.shape_cast %56 : vector<8xf32> to vector<8x1xf32>
    %58 = arith.addf %55, %57 : vector<8x1xf32>
    %c0_31 = arith.constant 0 : index
    %c0_32 = arith.constant 0 : index
    %59 = vector.load %arg15[%c0_31, %c0_32] : memref<8x1xf32, #tpu.memory_space<vmem>>, vector<8x1xf32>
    tpu.vector_store %arg15[%c0_31, %c0_32], %58 {strides = array<i32>} : memref<8x1xf32, #tpu.memory_space<vmem>>, vector<8x1xf32>,
    %c0_33 = arith.constant 0 : index
    %c0_34 = arith.constant 0 : index
    %60 = vector.load %arg16[%c0_33, %c0_34] : memref<8x16xf32, #tpu.memory_space<vmem>>, vector<8x16xf32>
    %61 = vector.broadcast %50 : vector<8x1xf32> to vector<8x16xf32>
    %62 = arith.mulf %61, %60 : vector<8x16xf32>
    %63 = arith.truncf %53 : vector<8x8xf32> to vector<8x8xbf16>
    %cst_35 = arith.constant dense<0.000000e+00> : vector<8x16xf32>
    %64 = tpu.matmul %63, %42, %cst_35 {dimension_numbers = #tpu.dot_dimension_numbers<[1], [0], [0], [1], [0, 0, 1, 1], [], []>} : vector<8x8xbf16>, vector<8x16xbf16>, vector<8x16xf32> -> vector<8x16xf32>
    %65 = arith.addf %62, %64 : vector<8x16xf32>
    %c0_36 = arith.constant 0 : index
    %c0_37 = arith.constant 0 : index
    %66 = vector.load %arg16[%c0_36, %c0_37] : memref<8x16xf32, #tpu.memory_space<vmem>>, vector<8x16xf32>
    tpu.vector_store %arg16[%c0_36, %c0_37], %65 {strides = array<i32>} : memref<8x16xf32, #tpu.memory_space<vmem>>, vector<8x16xf32>,
    %c0_38 = arith.constant 0 : index
    %c0_39 = arith.constant 0 : index
    %67 = vector.load %arg14[%c0_38, %c0_39] : memref<8x1xf32, #tpu.memory_space<vmem>>, vector<8x1xf32>
    tpu.vector_store %arg14[%c0_38, %c0_39], %48 {strides = array<i32>} : memref<8x1xf32, #tpu.memory_space<vmem>>, vector<8x1xf32>,
    %c0_i32_40 = arith.constant 0 : i32
    %68 = arith.cmpi eq, %arg3, %c0_i32_40 : i32
    %69 = arith.extui %68 : i1 to i32
    %c0_i32_41 = arith.constant 0 : i32
    %70 = arith.cmpi ne, %69, %c0_i32_41 : i32
    scf.if %70 {
      %c0_43 = arith.constant 0 : index
      %c0_44 = arith.constant 0 : index
      %75 = vector.load %arg15[%c0_43, %c0_44] : memref<8x1xf32, #tpu.memory_space<vmem>>, vector<8x1xf32>
      %76 = tpu.reciprocal %75 {approx = true} : vector<8x1xf32> -> vector<8x1xf32>
      %c0_45 = arith.constant 0 : index
      %c0_46 = arith.constant 0 : index
      %77 = vector.load %arg16[%c0_45, %c0_46] : memref<8x16xf32, #tpu.memory_space<vmem>>, vector<8x16xf32>
      %78 = vector.broadcast %76 : vector<8x1xf32> to vector<8x16xf32>
      %79 = arith.mulf %77, %78 : vector<8x16xf32>
      %c0_47 = arith.constant 0 : index
      %c0_48 = arith.constant 0 : index
      %80 = vector.load %arg17[%c0_47, %c0_48] : memref<8x32xf32, #tpu.memory_space<vmem>>, vector<8x32xf32>
      %81 = arith.truncf %79 : vector<8x16xf32> to vector<8x16xbf16>
      %c0_49 = arith.constant 0 : index
      %c0_50 = arith.constant 0 : index
      %c0_51 = arith.constant 0 : index
      %82 = vector.load %arg11[%c0_49, %c0_50, %c0_51] : memref<1x16x32xf32, #tpu.memory_space<vmem>>, vector<1x16x32xf32>
      %83 = vector.shape_cast %82 : vector<1x16x32xf32> to vector<16x32xf32>
      %84 = arith.truncf %83 : vector<16x32xf32> to vector<16x32xbf16>
      %cst_52 = arith.constant dense<0.000000e+00> : vector<8x32xf32>
      %85 = tpu.matmul %81, %84, %cst_52 {dimension_numbers = #tpu.dot_dimension_numbers<[1], [0], [0], [1], [0, 0, 1, 1], [], []>} : vector<8x16xbf16>, vector<16x32xbf16>, vector<8x32xf32> -> vector<8x32xf32>
      %86 = arith.addf %80, %85 : vector<8x32xf32>
      %c0_53 = arith.constant 0 : index
      %c0_54 = arith.constant 0 : index
      %87 = vector.load %arg17[%c0_53, %c0_54] : memref<8x32xf32, #tpu.memory_space<vmem>>, vector<8x32xf32>
      tpu.vector_store %arg17[%c0_53, %c0_54], %86 {strides = array<i32>} : memref<8x32xf32, #tpu.memory_space<vmem>>, vector<8x32xf32>,
    } else {
    }
    %c1_i32 = arith.constant 1 : i32
    %71 = arith.cmpi eq, %arg2, %c1_i32 : i32
    %72 = arith.andi %68, %71 : i1
    %73 = arith.extui %72 : i1 to i32
    %c0_i32_42 = arith.constant 0 : i32
    %74 = arith.cmpi ne, %73, %c0_i32_42 : i32
    scf.if %74 {
      %c0_43 = arith.constant 0 : index
      %c0_44 = arith.constant 0 : index
      %75 = vector.load %arg17[%c0_43, %c0_44] : memref<8x32xf32, #tpu.memory_space<vmem>>, vector<8x32xf32>
      %76 = vector.shape_cast %75 : vector<8x32xf32> to vector<1x8x32xf32>
      %c0_45 = arith.constant 0 : index
      %c0_46 = arith.constant 0 : index
      %c0_47 = arith.constant 0 : index
      %77 = vector.load %arg12[%c0_45, %c0_46, %c0_47] : memref<1x8x32xf32, #tpu.memory_space<vmem>>, vector<1x8x32xf32>
      tpu.vector_store %arg12[%c0_45, %c0_46, %c0_47], %76 {strides = array<i32>} : memref<1x8x32xf32, #tpu.memory_space<vmem>>, vector<1x8x32xf32>,
    } else {
    }
    return
  }
  func.func @transform_0(%arg0: i32, %arg1: i32, %arg2: i32, %arg3: i32) -> (i32, i32, i32) {
    %c0_i32 = arith.constant 0 : i32
    %c0_i32_0 = arith.constant 0 : i32
    return %arg0, %arg1, %c0_i32 : i32, i32, i32
  }
  func.func @transform_1(%arg0: i32, %arg1: i32, %arg2: i32, %arg3: i32) -> (i32, i32, i32) {
    %c0_i32 = arith.constant 0 : i32
    %c0_i32_0 = arith.constant 0 : i32
    return %arg0, %arg3, %c0_i32 : i32, i32, i32
  }
  func.func @transform_2(%arg0: i32, %arg1: i32, %arg2: i32, %arg3: i32) -> (i32, i32) {
    %c0_i32 = arith.constant 0 : i32
    %c0_i32_0 = arith.constant 0 : i32
    %c0_i32_1 = arith.constant 0 : i32
    return %c0_i32, %c0_i32_0 : i32, i32
  }
  func.func @transform_3(%arg0: i32, %arg1: i32, %arg2: i32, %arg3: i32) -> (i32, i32) {
    %c0_i32 = arith.constant 0 : i32
    %c0_i32_0 = arith.constant 0 : i32
    %c0_i32_1 = arith.constant 0 : i32
    return %c0_i32, %c0_i32_0 : i32, i32
  }
  func.func @transform_4(%arg0: i32, %arg1: i32, %arg2: i32, %arg3: i32) -> (i32, i32, i32) {
    %c0_i32 = arith.constant 0 : i32
    %c0_i32_0 = arith.constant 0 : i32
    %c0_i32_1 = arith.constant 0 : i32
    return %arg2, %c0_i32, %c0_i32_0 : i32, i32, i32
  }
  func.func @transform_5(%arg0: i32, %arg1: i32, %arg2: i32, %arg3: i32) -> (i32, i32, i32) {
    %c0_i32 = arith.constant 0 : i32
    %c0_i32_0 = arith.constant 0 : i32
    %c0_i32_1 = arith.constant 0 : i32
    return %arg2, %c0_i32, %c0_i32_0 : i32, i32, i32
  }
  func.func @transform_6(%arg0: i32, %arg1: i32, %arg2: i32, %arg3: i32) -> (i32, i32, i32) {
    %c0_i32 = arith.constant 0 : i32
    %c0_i32_0 = arith.constant 0 : i32
    %c0_i32_1 = arith.constant 0 : i32
    return %arg2, %c0_i32, %c0_i32_0 : i32, i32, i32
  }
  func.func @transform_7(%arg0: i32, %arg1: i32, %arg2: i32, %arg3: i32) -> (i32, i32, i32) {
    %c0_i32 = arith.constant 0 : i32
    %c0_i32_0 = arith.constant 0 : i32
    %c0_i32_1 = arith.constant 0 : i32
    return %arg2, %c0_i32, %c0_i32_0 : i32, i32, i32
  }
  func.func @transform_8(%arg0: i32, %arg1: i32, %arg2: i32, %arg3: i32) -> (i32, i32, i32) {
    %c0_i32 = arith.constant 0 : i32
    %c0_i32_0 = arith.constant 0 : i32
    return %arg0, %arg1, %c0_i32 : i32, i32, i32
  }
}

</mosaic_0001>

<bundles_post_ra>
// kernel: tpu_custom_call.1
= control target key start
LH: loop header
LB: loop body
LE: loop exit
PB: predicated region body
PF: predicated region fallthrough
CT: control target
= control target key end

     0   :  { %s1601_s0 = inlined_call_operand.vmem [shape: f32[2,8,32], index: 0, kind: input, shape index: {}]   ;;  %s1602_s1 = inlined_call_operand.vmem [shape: f32[2,8,32], index: 1, kind: input, shape index: {}]   ;;  %s1603_s2 = inlined_call_operand.vmem [shape: f32[1,32], index: 2, kind: input, shape index: {}]   ;;  %s1604_s3 = inlined_call_operand.vmem [shape: f32[1,32], index: 3, kind: input, shape index: {}]   ;;  %s1605_s4 = inlined_call_operand.vmem [shape: f32[2,32,16], index: 4, kind: input, shape index: {}]   ;;  %s1606_s5 = inlined_call_operand.vmem [shape: f32[2,32,16], index: 5, kind: input, shape index: {}]   ;;  %s1607_s6 = inlined_call_operand.vmem [shape: f32[2,32,16], index: 6, kind: input, shape index: {}]   ;;  %s1608_s7 = inlined_call_operand.vmem [shape: f32[2,16,32], index: 7, kind: input, shape index: {}]   ;;  %s1609_s8 = inlined_call_operand.hbm [shape: f32[2,8,32], index: 8, kind: output, shape index: {}]  }
   0x1   :  { %1617 = sst [smem:[#allocation18_spill]] %s1603_s2 }
   0x2   :  { %1618 = sst [smem:[#allocation19_spill]] %s1604_s3 }
   0x3   :  { %13 = vsyncpa [#allocation8], 0 }
   0x4   :  { %15 = vsyncpa [#allocation8 + $0x1], 0  ;;  %s1365_s27 = smov 0   ;;  %s1367_s28 = smov 0  }
   0x5   :  { %s1369_s29 = smov 0   ;;  %s1371_s30 = smov 0  }
   0x6   :  { %s1373_s9 = smov 0   ;;  %s1375_s10 = smov 0  }
   0x7   :  { %s1377_s11 = smov 0   ;;  %s1379_s12 = smov 0  }
   0x8 LB: > { %1619 = sst [smem:[#allocation10_spill]] %s1284_s27  ;;  %s1037_s13 = sadd.s32 4294967295, %s1312_s12   ;;  %s1312_s12 = sphi %s1379_s12, %s21_s12   ;;  %s1308_s11 = sphi %s1377_s11, %s1639_s11   ;;  %s1304_s10 = sphi %s1375_s10, %s1638_s10   ;;  %s1300_s9 = sphi %s1373_s9, %s1637_s9   ;;  %s1296_s30 = sphi %s1371_s30, %s1636_s30   ;;  %s1292_s29 = sphi %s1369_s29, %s1635_s29   ;;  %s1288_s28 = sphi %s1367_s28, %s1641_s28   ;;  %s1284_s27 = sphi %s1365_s27, %s1640_s27  }
   0x9   : > { %1620 = sst [smem:[#allocation11_spill]] %s1292_s29  ;;  %s1038_s14 = sadd.s32 4294967294, %s1312_s12  }
   0xa   : > { %1621 = sst [smem:[#allocation12_spill]] %s1304_s10  ;;  %s39_s15 = sadd.s32 1, %s1304_s10 }
   0xb   : > { %1622 = sst [smem:[#allocation13_spill]] %s1308_s11  ;;  %p41_p0 = scmp.ge.s32.totalorder %s39_s15, 2 }
   0xc   : > { %s47_s16 = sadd.s32 1, %s1308_s11  ;;  %p268_p1 = scmp.ne.s32.totalorder %s1292_s29, %s1288_s28 }
   0xd   : > { %p269_p2 = scmp.eq.s32.totalorder %s1037_s13, 3  ;;  %s1643_s15 = smov (%p41_p0, %s39_s15), 0 }
   0xe   : > { %1623 = sst [smem:[#allocation14_spill]] %s1643_s15  ;;  %s1645_s16 = smov (!%p41_p0, %s47_s16), %s1308_s11 }
   0xf   : > { %p1414_p3 = por %p269_p2, %p268_p1  ;;  %p274_p4 = scmp.ne.s32.totalorder %s1288_s28, %s1284_s27 }
  0x10   : > { %p49_p5 = scmp.ge.s32.totalorder %s1645_s16, 2  ;;  %p275_p6 = scmp.eq.s32.totalorder %s1038_s14, 3 }
  0x11   : > { %p1041_p7 = scmp.ge.s32.totalorder %s1312_s12, 1  ;;  %p351_p8 = scmp.lt.s32.totalorder %s1312_s12, 5 }
  0x12   : > { %s1647_s16 = smov (%p49_p5, %s1645_s16), 0  ;;  %p1424_p9 = por %p275_p6, %p274_p4 }
  0x13   : > { %1625 = sst [smem:[#allocation15_spill]] %s1647_s16  ;;  %p352_p10 = pnand %p1041_p7, %p351_p8 }
  0x14   : > { %s1626_s18 = scalar_select %p1424_p9, 1, 0 }
  0x15   : > { %s253_s19 = ssub.s32 %s1308_s11, %s1647_s16  ;;  %s258_s20 = sadd.s32 1, %s1292_s29 }
  0x16   : > { %1627 = sst [smem:[#allocation16_spill]] %s1626_s18  ;;  %p256_p11 = scmp.eq.s32.totalorder %s253_s19, 0 }
  0x17   : > { %355 = sbr.rel (%p352_p10) target bundleno = 1625 (0x659), region = 52  ;;  %s1613_s22 = sand.u32 (!%p352_p10), 1, %s1288_s28  }
  0x18   : > { %s1432_s21 = scalar_select %p256_p11, %s1292_s29, %s258_s20  }
  0x19   : > { %p414_p12 = scmp.lt.s32.totalorder (!%p352_p10), %s1300_s9, 1  ;;  %s1629_s2 = sld [smem:[#allocation18_spill]] (!%p352_p10) }
  0x1a   : > { %1628 = sst [smem:[#allocation17_spill]] %s1432_s21  ;;  %s1630_s3 = sld [smem:[#allocation19_spill]] (!%p352_p10) }
  0x1b   : > { %s1448_s13 = sshll.u32 (!%p352_p10), %s1613_s22, 3  ;;  %p428_p13 = scmp.lt.s32.totalorder (!%p352_p10), %s1296_s30, 1 }
  0x1c   : > { %p451_p0 = scmp.eq.s32.totalorder (!%p352_p10), %s1296_s30, 0 }
  0x1e   : > { %s415_s14 = scalar_select %p414_p12, %s1300_s9, 1 }
  0x1f   : > { %v1439_v0 = vld [vmem:[%s1629_s2] ss:$0 sm:$0xff]  ;;  %s429_s19 = scalar_select %p428_p13, %s1296_s30, 1 }
  0x20   : > { %v1444_v1 = vld [vmem:[%s1630_s3] ss:$0 sm:$0xff]  ;;  %s1043_s20 = sshll.u32 %s415_s14, 3  ;;  %456 = sbr.rel (!%p451_p0) target bundleno = 39 (0x27), region = 56  ;;  %vm457_vm0 = vcmask (%p451_p0), 261120   ;;  %v1314_v2 = vmov (%p451_p0), 0.0  }
  0x21   : > { %s420_s23 = scalar_lea.vmem %s1601_s0, %s1043_s20  ;;  %s427_s11 = scalar_lea.vmem %s1602_s1, %s1043_s20  ;;  %458 = vst.msk [vmem:[#allocation6] sm:$0xff] (%p451_p0), %vm457_vm0, %v1314_v2 }
  0x22   : > { %s1065_s25 = sshll.u32 %s429_s19, 5  ;;  %s1068_s26 = sshll.u32 %s429_s19, 4 }
  0x23   : > { %s1463_s22 = scalar_lea.vmem %s1605_s4, %s1065_s25  ;;  %s1468_s18 = scalar_lea.vmem %s1606_s5, %s1065_s25 }
  0x24   : > { %s1473_s15 = scalar_lea.vmem %s1607_s6, %s1065_s25  ;;  %s1478_s20 = scalar_lea.vmem %s1608_s7, %s1068_s26 }
  0x25   : > { %s413_s19 = scalar_lea.vmem [#allocation7], %s1448_s13 }
  0x27 PF: > { %v462_v3 = vld [vmem:[%s420_s23] sm:$0xff]  ;;  %vm463_vm1 = vcmask 261120   ;;  %v494_v18 = vld [vmem:[%s1463_s22 + $0x8] sm:$0xff]  ;;  %v495_v19 = vld [vmem:[%s1463_s22 + $0x10] sm:$0xff]  ;;  %v1315_v20 = vmov 0.0   ;;  %vm1316_vm2 = vmmov 0  }
  0x28   : > { %v551_v4 = vld [vmem:[%s427_s11] sm:$0xff]  ;;  %v464_v5 = vsel %vm463_vm1, %v462_v3, 0.0  ;;  %1088 = vmatprep.subr.bf16.mxu0 %v1315_v20  ;;  %1096 = vmatprep.subr.bf16.mxu1 %v1315_v20  ;;  %v496_v22 = vld [vmem:[%s1463_s22 + $0x18] sm:$0xff]  ;;  %v583_v24 = vld [vmem:[%s1468_s18 + $0x8] sm:$0xff]  ;;  %vm549_vm3 = vcmask 130048   ;;  %vm544_vm4 = vcmask 125952  }
  0x29   : > { %465 = vadd.xlane.f32.xlu0 %v464_v5  ;;  %v553_v6 = vsel %vm463_vm1, %v551_v4, 0.0  ;;  %v493_v17 = vld [vmem:[%s1463_s22] sm:$0xff]  ;;  %1092 = vmatprep.mubr.msk.bf16.mxu0 %vm1316_vm2, %v1315_v20  ;;  %v498_v26 = vpack.c.bf16 %v496_v22, %v495_v19  ;;  %v584_v27 = vld [vmem:[%s1468_s18 + $0x10] sm:$0xff]  ;;  %v585_v28 = vld [vmem:[%s1468_s18 + $0x18] sm:$0xff]  ;;  %550 = vst.msk [vmem:[#allocation5] sm:$0xff] %vm549_vm3, %v1315_v20  ;;  %vm763_vm5 = vcmask 1043456  }
  0x2a   : > { %v497_v21 = vpack.c.bf16 %v494_v18, %v493_v17  ;;  %v582_v23 = vld [vmem:[%s1468_s18] sm:$0xff]  ;;  %1100 = vmatprep.mubr.msk.bf16.mxu1 %vm1316_vm2, %v1315_v20  ;;  %v587_v29 = vpack.c.bf16 %v585_v28, %v584_v27  ;;  %v633_v40 = vld [vmem:[%s1473_s15 + $0x8] sm:$0xff]  ;;  %v634_v47 = vld [vmem:[%s1473_s15 + $0x10] sm:$0xff]  ;;  %vm546_vm6 = vcmask 7168   ;;  %vm728_vm7 = vcmask 64512   ;;  %p872_p1 = scmp.eq.s32.totalorder %s1296_s30, 1 }
  0x2b   : > { %v586_v25 = vpack.c.bf16 %v583_v24, %v582_v23  ;;  %v632_v39 = vld [vmem:[%s1473_s15] sm:$0xff]  ;;  %v635_v48 = vld [vmem:[%s1473_s15 + $0x18] sm:$0xff]  ;;  %548 = vst.msk [vmem:[#allocation4] sm:$0xff] %vm546_vm6, %v1315_v20  ;;  %v825_v27 = vld [vmem:[%s1478_s20 + $0x8] sm:$0xff] }
  0x2c   : > { %1089 = vmatpush3.bf16.msra.mxu0 %v497_v21  ;;  %v636_v44 = vpack.c.bf16 %v633_v40, %v632_v39  ;;  %v637_v50 = vpack.c.bf16 %v635_v48, %v634_v47  ;;  %v822_v47 = vld [vmem:[#allocation6] sm:$0xff] }
  0x2d   : > { %554 = vadd.xlane.f32.xlu0 %v553_v6  ;;  %1090 = vmatprep.subr.bf16.mxu0 %v1315_v20 }
  0x2e   : > { %1097 = vmatpush3.bf16.msra.mxu1 %v586_v25 }
  0x2f   : > { %1098 = vmatprep.subr.bf16.mxu1 %v1315_v20 }
  0x30   : > { %1091 = vmatpush3.bf16.msra.mxu0 %v498_v26  ;;  %v824_v26 = vld [vmem:[%s1478_s20] sm:$0xff] }
  0x31   : > { %1104 = vmatprep.subr.bf16.mxu0 %v1315_v20  ;;  %v826_v28 = vpack.c.bf16 %v825_v27, %v824_v26 }
  0x32   : > { %1099 = vmatpush3.bf16.msra.mxu1 %v587_v29  ;;  %v744_v29 = vld [vmem:[#allocation4] sm:$0xff] }
  0x33   : > { %1112 = vmatprep.subr.bf16.mxu1 %v1315_v20 }
  0xb6   : > { %v466_v7 = vpop.xlane.xlu0 %465 }
  0xb7   : > { %v468_v8 = vmul.f32 0.03125, %v466_v7  ;;  %v1317_v7 = vmov -inf  }
  0xb8   : > { %547 = vst.msk [vmem:[#allocation3] sm:$0xff] %vm546_vm6, %v1317_v7 }
  0xb9   : > { %v469_v9 = vsub.f32 %v462_v3, %v468_v8 }
  0xba   : > { %v555_v10 = vpop.xlane.xlu0 %554 }
  0xbb   : > { %v557_v11 = vmul.f32 0.03125, %v555_v10  ;;  %v470_v12 = vmul.f32 %v469_v9, %v469_v9 }
  0xbd   : > { %v558_v13 = vsub.f32 %v551_v4, %v557_v11  ;;  %v471_v14 = vsel %vm463_vm1, %v470_v12, 0.0 }
  0xbe   : > { %472 = vadd.xlane.f32.xlu1 %v471_v14 }
  0xbf   : > { %v559_v15 = vmul.f32 %v558_v13, %v558_v13  ;;  %v727_v14 = vld [vmem:[#allocation3] sm:$0xff] }
  0xc1   : > { %v560_v16 = vsel %vm463_vm1, %v559_v15, 0.0 }
  0xc2   : > { %561 = vadd.xlane.f32.xlu1 %v560_v16 }
 0x14b   : > { %v473_v30 = vpop.xlane.xlu1 %472 }
 0x14c   : > { %v474_v31 = vmul.f32 0.03125, %v473_v30 }
 0x14e   : > { %v475_v32 = vadd.f32 1e-05, %v474_v31 }
 0x14f   : > { %v562_v33 = vpop.xlane.xlu1 %561 }
 0x150   : > { %1208 = vrsqrt.f32 %v475_v32  ;;  %v563_v34 = vmul.f32 0.03125, %v562_v33 }
 0x152   : > { %v564_v35 = vadd.f32 1e-05, %v563_v34 }
 0x154   : > { %1210 = vrsqrt.f32 %v564_v35  ;;  %v752_v35 = vld [vmem:[#allocation5] sm:$0xff] }
 0x15a   : > { %v1209_v36 = vpop.eup %1208 }
 0x15b   : > { %v477_v37 = vmul.f32 %v1209_v36, %v469_v9 }
 0x15d   : > { %v484_v38 = vmul.f32 %v1439_v0, %v477_v37 }
 0x15e   : > { %v1211_v41 = vpop.eup %1210 }
 0x15f   : > { %v491_v42 = vadd.f32 %v1444_v1, %v484_v38  ;;  %v566_v43 = vmul.f32 %v1211_v41, %v558_v13  ;;  %v1318_v13 = vmov 0  }
 0x160   : > { %1206 = vset.pattern.permute.xlu1 %v1318_v13  ;;  %1207 = vset.pattern.permute.xlu0 %v1318_v13 }
 0x161   : > { %v492_v45 = vpack.c.bf16 %v491_v42, %v491_v42  ;;  %v573_v46 = vmul.f32 %v1439_v0, %v566_v43 }
 0x163   : > { %1093 = vmatmul.mubr.msk.bf16.vlgmr.msra.gmra.mrb[0].mxu0 %vm463_vm1, %v492_v45  ;;  %v580_v49 = vadd.f32 %v1444_v1, %v573_v46 }
 0x164   : > { %1105 = vmatpush3.bf16.msra.mxu0 %v636_v44  ;;  %1108 = vmatprep.mubr.msk.bf16.mxu0 %vm1316_vm2, %v1315_v20 }
 0x165   : > { %v581_v51 = vpack.c.bf16 %v580_v49, %v580_v49  ;;  %1106 = vmatprep.subr.bf16.mxu0 %v1315_v20 }
 0x167   : > { %1101 = vmatmul.mubr.msk.bf16.vlgmr.msra.gmra.mrb[0].mxu1 %vm463_vm1, %v581_v51 }
 0x168   : > { %1107 = vmatpush3.bf16.msra.mxu0 %v637_v50  ;;  %1114 = vmatprep.mubr.msk.bf16.mxu1 %vm1316_vm2, %v1315_v20 }
 0x169   : > { %1118 = vmatprep.subr.bf16.mxu0 %v1315_v20 }
 0x16b   : > { %1109 = vmatmul.mubr.msk.bf16.vlgmr.msra.gmra.mrb[4].mxu0 %vm463_vm1, %v581_v51 }
 0x16c   : > { %1120 = vmatprep.mubr.msk.bf16.mxu0 %vm1316_vm2, %v1315_v20 }
 0x236   : > { %v536_v52 = vpop.f32.mrb[0].mxu0 }
 0x237   : > { %v542_v53 = vmul.f32 0.25, %v536_v52  ;;  %v1094_v54 = vpop.f32.mrb[1].mxu0 }
 0x238   : > { %v539_v55 = vpop.f32.mrb[2].mxu0 }
 0x239   : > { %v543_v56 = vpack.c.bf16 %v542_v53, %v542_v53  ;;  %v1095_v57 = vpop.f32.mrb[3].mxu0 }
 0x23a   : > { %v625_v58 = vpop.f32.mrb[0].mxu1 }
 0x23b   : > { %545 = vst.msk [vmem:[#allocation2] sm:$0xf] %vm544_vm4, %v543_v56  ;;  %v631_v59 = vpack.c.bf16 %v625_v58, %v625_v58  ;;  %v1102_v60 = vpop.f32.mrb[1].mxu1 }
 0x23c   : > { %v628_v61 = vpop.f32.mrb[2].mxu1 }
 0x23d   : > { %v685_v62 = vsel %vm549_vm3, %v631_v59, 0  ;;  %v1103_v63 = vpop.f32.mrb[3].mxu1 }
 0x23e   : > { %v672_v0 = vpop.f32.mrb[4].mxu0  ;;  %1113 = vmatpush3.bf16.xpose.msra.mxu1 %v685_v62 }
 0x23f   : > { %v678_v1 = vpack.c.bf16 %v672_v0, %v672_v0  ;;  %v1110_v2 = vpop.f32.mrb[5].mxu0  ;;  %1124 = vmatprep.subr.bf16.mxu1 %v1315_v20 }
 0x240   : > { %v675_v3 = vpop.f32.mrb[6].mxu0 }
 0x241   : > { %v765_v4 = vsel %vm763_vm5, %v678_v1, 0  ;;  %v1111_v5 = vpop.f32.mrb[7].mxu0 }
 0x242   : > { %1119 = vmatpush3.bf16.msra.mxu0 %v765_v4  ;;  %v679_v6 = vld [vmem:[#allocation2] sm:$0xf] }
 0x245   : > { %1115 = vmatmul.mubr.msk.bf16.vlgmr.msra.gmra.mrb[4].mxu1 %vm549_vm3, %v679_v6 }
 0x246   : > { %1126 = vmatprep.mubr.msk.bf16.mxu1 %vm1316_vm2, %v1315_v20  ;;  %1125 = vmatpush3.bf16.msra.mxu1 %v826_v28 }
 0x318   : > { %v721_v8 = vpop.f32.mrb[4].mxu1 }
 0x319   : > { %v1116_v9 = vpop.f32.mrb[5].mxu1  ;;  %v729_v10 = vsel %vm728_vm7, %v721_v8, -inf }
 0x31a   : > { %730 = vmax.xlane.f32.xlu0 %v729_v10  ;;  %v724_v11 = vpop.f32.mrb[6].mxu1 }
 0x31b   : > { %v1117_v12 = vpop.f32.mrb[7].mxu1 }
 0x3a7   : > { %v731_v15 = vpop.xlane.xlu0 %730 }
 0x3a8   : > { %v732_v16 = vmax.f32 %v727_v14, %v731_v15 }
 0x3aa   : > { %v733_v17 = vsub.f32 %v727_v14, %v732_v16  ;;  %809 = vst.msk [vmem:[#allocation3] sm:$0xff] %vm546_vm6, %v732_v16  ;;  %738 = vperm.xlu1 %1206, %v732_v16  }
 0x3ac   : > { %v734_v24 = vmul.f32 1.442695, %v733_v17 }
 0x429   : > { %v739_v18 = vpop.permute.xlu1 %738 }
 0x42a   : > { %v741_v19 = vsub.f32 %v721_v8, %v739_v18 }
 0x42c   : > { %v742_v20 = vmul.f32 1.442695, %v741_v19 }
 0x42e   : > { %1212 = vpow2.f32 %v742_v20 }
 0x42f   : > { %1214 = vpow2.f32 %v734_v24 }
 0x438   : > { %v1213_v21 = vpop.eup %1212 }
 0x439   : > { %v746_v22 = vsel %vm728_vm7, %v1213_v21, 0.0  ;;  %v759_v23 = vpack.c.bf16 %v1213_v21, %v1213_v21  ;;  %v1215_v25 = vpop.eup %1214 }
 0x43a   : > { %747 = vadd.xlane.f32.xlu0 %v746_v22  ;;  %v745_v30 = vmul.f32 %v1215_v25, %v744_v29 }
 0x43b   : > { %1121 = vmatmul.mubr.msk.bf16.vlgmr.msra.gmra.mrb[8].mxu0 %vm728_vm7, %v759_v23 }
 0x450   : > { %755 = vperm.xlu0 %1207, %v1215_v25  }
 0x4c7   : > { %v748_v31 = vpop.xlane.xlu0 %747 }
 0x4c8   : > { %v749_v32 = vadd.f32 %v748_v31, %v745_v30 }
 0x4ca   : > { %751 = vst.msk [vmem:[#allocation4] sm:$0xff] %vm546_vm6, %v749_v32 }
 0x4cf   : > { %v756_v36 = vpop.permute.xlu0 %755 }
 0x4d0   : > { %v758_v37 = vmul.f32 %v756_v36, %v752_v35 }
 0x4d1   : > { %v813_v33 = vld [vmem:[#allocation4] sm:$0xff] }
 0x4d2   : > { %1216 = vrcp.f32 %v813_v33 }
 0x4dc   : > { %v1217_v34 = vpop.eup %1216 }
 0x4dd   : > { %818 = vperm.xlu1 %1206, %v1217_v34  }
 0x50e   : > { %v801_v38 = vpop.f32.mrb[8].mxu0 }
 0x50f   : > { %v807_v39 = vadd.f32 %v801_v38, %v758_v37  ;;  %v1122_v40 = vpop.f32.mrb[9].mxu0 }
 0x510   : > { %v804_v41 = vpop.f32.mrb[10].mxu0 }
 0x511   : > { %808 = vst.msk [vmem:[#allocation5] sm:$0xff] %vm549_vm3, %v807_v39  ;;  %v1123_v42 = vpop.f32.mrb[11].mxu0 }
 0x518   : > { %v815_v43 = vld [vmem:[#allocation5] sm:$0xff] }
 0x55c   : > { %v819_v44 = vpop.permute.xlu1 %818 }
 0x55d   : > { %v821_v45 = vmul.f32 %v819_v44, %v815_v43 }
 0x55f   : > { %v823_v46 = vpack.c.bf16 %v821_v45, %v821_v45 }
 0x561   : > { %1127 = vmatmul.mubr.msk.bf16.vlgmr.msra.gmra.mrb[8].mxu1 %vm549_vm3, %v823_v46 }
 0x631   : > { %876 = sbr.rel (!%p872_p1) target bundleno = 1600 (0x640), region = 68 }
 0x634   : > { %v864_v48 = vpop.f32.mrb[8].mxu1 }
 0x635   : > { %v870_v49 = vadd.f32 %v864_v48, %v822_v47  ;;  %v1128_v50 = vpop.f32.mrb[9].mxu1 }
 0x636   : > { %v867_v51 = vpop.f32.mrb[10].mxu1 }
 0x637   : > { %871 = vst.msk [vmem:[#allocation6] sm:$0xff] %vm463_vm1, %v870_v49  ;;  %v1129_v52 = vpop.f32.mrb[11].mxu1 }
 0x63e   : > { %v877_v53 = vld [vmem:[#allocation6] sm:$0xff] }
 0x63f   : > { %878 = vst.msk [vmem:[%s413_s19] sm:$0xff] %vm463_vm1, %v877_v53 }
 0x640 PF: > { %s1062_s3 = sshll.u32 %s1300_s9, 7  ;;  %s894_s10 = sshll.u32 %s413_s19, 4  ;;  %s895_s10 = int_to_ptr.vmem [resolvable:$true] %s894_s10 }
 0x641   : > { %s1550_s30 = scalar_lea.hbm %s1609_s8, %s1062_s3  ;;  %s1631_s11 = sand.u32 1, %s1288_s28  }
 0x642   : > { %s880_s18 = scalar_lea.sflag [#allocation8], %s1631_s11  ;;  %s1218_s21 = scalar_lea.vmem %s895_s10, 128 }
 0x643   : > { %p1219_p2 = scmp.ne.s32.totalorder %s895_s10, %s1218_s21  ;;  %s1319_s22 = smov [#allocation7]  }
 0x644   : > { %s1222_s23 = sshll.u32 %s1319_s22, 4  ;;  %s1223_s23 = int_to_ptr.vmem [resolvable:$false] %s1222_s23 }
 0x645   : > { %p1220_p4 = pnand %p1219_p2, %p1414_p3  ;;  %s1224_s24 = scalar_lea.vmem %s1223_s23, 256 }
 0x646   : > { %p1225_p6 = scmp.lt.s32.totalorder %s895_s10, %s1223_s23  ;;  %p1226_p7 = scmp.lt.s32.totalorder %s1224_s24, %s1218_s21 }
 0x647   : > { %p1221_p5 = pneg %p1220_p4 }
 0x648   : > { %p1227_p8 = por %p1226_p7, %p1225_p6 }
 0x64a   : > { %p1228_p10 = pnand %p1227_p8, %p1221_p5 }
 0x64c   : > { %1231 = shalt.err (!%p1228_p10)
}
 0x64d   : > { %s1232_s9 = scalar_lea.hbm %s1550_s30, 128  ;;  %s1236_s26 = scalar_lea.hbm %s1609_s8, 256 }
 0x64e   : > { %p1233_p11 = scmp.ne.s32.totalorder %s1550_s30, %s1232_s9  ;;  %p1237_p0 = scmp.lt.u32.totalorder %s1550_s30, %s1609_s8 }
 0x64f   : > { %p1238_p1 = scmp.lt.u32.totalorder %s1236_s26, %s1232_s9  ;;  %p1240_p4 = scmp.lt.u32.totalorder %s1232_s9, %s1550_s30 }
 0x650   : > { %p1234_p12 = pnand %p1233_p11, %p1414_p3 }
 0x651   : > { %p1239_p2 = por %p1238_p1, %p1237_p0 }
 0x652   : > { %p1235_p13 = pneg %p1234_p12 }
 0x653   : > { %p1241_p5 = por %p1240_p4, %p1239_p2 }
 0x655   : > { %p1242_p6 = pnand %p1241_p5, %p1235_p13 }
 0x657   : > { %1245 = shalt.err (!%p1242_p6)
}
 0x658   : > { %1130 = dma.vmem_to_hbm [thread:$0]  (%p1414_p3), %s895_s10, 128, %s1550_s30, %s880_s18  }
 0x659 PF: > { %s1632_s16 = sld [smem:[#allocation10_spill]]  ;;  %p1136_p7 = scmp.ge.s32.totalorder %s1312_s12, 2 }
 0x65b   : > { %p1133_p8 = pnand %p1136_p7, %p1424_p9 }
 0x65f   : > { %s906_s20 = sand.u32 1, %s1632_s16  }
 0x660   : > { %s907_s19 = scalar_lea.sflag [#allocation8], %s906_s20 }
 0x661   : > { %1279 = dma.done.wait (!%p1133_p8), %s907_s19, 128  }
 0x662   : > { %1281 = vsyncadd (!%p1133_p8), %s907_s19, 4294967168  ;;  %s21_s12 = sadd.s32 1, %s1312_s12   ;;  %s1634_s3 = sld [smem:[#allocation11_spill]] }
 0x663   : > { %p18_p10 = scmp.ge.s32.totalorder %s21_s12, 6   ;;  %s1635_s29 = sld [smem:[#allocation17_spill]] }
 0x664   : > { %s1636_s30 = sld [smem:[#allocation12_spill]]  ;;  %s1637_s9 = sld [smem:[#allocation13_spill]] }
 0x665   : > { %s1638_s10 = sld [smem:[#allocation14_spill]]  ;;  %s1639_s11 = sld [smem:[#allocation15_spill]] }
 0x666   : > { %s1640_s27 = smov %s1288_s28  ;;  %20 = sbr.rel (!%p18_p10) target bundleno = 8 (0x8), region = 118 }
 0x668   : > { %s1641_s28 = smov %s1634_s3 }
 0x66d   :  { %912 = vsyncpa [#allocation8], 1 }
 0x66e   :  { %914 = vsyncpa [#allocation8 + $0x1], 1 }

</bundles_post_ra>
